<compile_context>
chip_gen: v7x
topology: tpu7x:2x2x1
jax: 0.10.0
libtpu: 0.0.40
codegen_flags: <defaults>
</compile_context>

<pallas_src>
import math

import jax
import jax.numpy as jnp
from jax.experimental import pallas as pl
from jax.experimental.pallas import tpu as pltpu


def _patch_embed_kernel(x_ref, w_ref, add_ref, o_ref):
    # x_ref:   (TB*(N+1), K)  patch rows for TB batch elems; row 0 of each
    #                          batch element is all-zero (becomes the cls row).
    # w_ref:   (K, E)          Linear weight, transposed (W.T).
    # add_ref: (TB*(N+1), E)   per-row additive table:
    #                          row 0     -> cls_token + positions[0]
    #                          rows 1..N -> bias + positions[1:]
    # o_ref:   (TB*(N+1), E)   output slab (reshaped to (TB, N+1, E) outside).
    proj = jnp.dot(x_ref[...], w_ref[...], preferred_element_type=jnp.float32)
    o_ref[...] = (proj + add_ref[...]).astype(o_ref.dtype)


def patch_embedding_linear(x, weight, bias, cls_token, positions, patch_size,
                           vmem_budget_bytes=8 * 1024 * 1024):
    """Forward pass of PatchEmbedding_Linear.

    x:         (b, c, H, W)                NCHW, W divisible by patch_size
    weight:    (emb_size, patch_size*c)    PyTorch nn.Linear layout
    bias:      (emb_size,)
    cls_token: (1, 1, emb_size)
    positions: (H*(W//patch_size) + 1, emb_size)
    returns:   (b, H*(W//patch_size) + 1, emb_size)
    """
    b, c, H, W = x.shape
    wp = W // patch_size
    n = H * wp                      # number of patches per batch element
    k = patch_size * c              # patch feature size
    e = weight.shape[0]             # emb_size
    rows_per_b = n + 1              # patches + cls row
    out_itemsize = jnp.dtype(x.dtype).itemsize

    # --- pick per-step batch tile TB ---------------------------------------
    # Whole batch in one grid step unless the VMEM budget forces a split
    # (x + add + out blocks, f32 worst case, double-buffered).  Per-step
    # overhead (~0.35us) dominates at these shapes, so fewer & bigger steps.
    per_row_bytes = (k + 2 * e) * 4 * 2
    max_tb = max(1, vmem_budget_bytes // (rows_per_b * per_row_bytes))
    tb = min(b, max_tb)
    if tb < b:
        # Multi-step grid: keep the block sublane dim (tb*(n+1)) 8-aligned.
        r = 8 // math.gcd(rows_per_b, 8)
        tb = max(r, (tb // r) * r)
    nb = pl.cdiv(b, tb)
    b_pad = nb * tb
    tile_rows = tb * rows_per_b

    # --- rearrange 'b c (h 1) (w s2) -> b (h w) (s2 c)' (one fused XLA copy) --
    xr = x.reshape(b, c, n, patch_size)
    xr = jnp.transpose(xr, (0, 2, 3, 1)).reshape(b, n, k)
    # Prepend one zero feature row per batch element -> its projection is 0,
    # so the add-table row 0 alone produces the cls row.
    xr = jnp.concatenate([jnp.zeros((b, 1, k), dtype=xr.dtype), xr], axis=1)
    if b_pad != b:
        xr = jnp.pad(xr, ((0, b_pad - b), (0, 0), (0, 0)))
    x2d = xr.reshape(b_pad * rows_per_b, k)      # flat rows -> real MXU M dim

    wt = weight.T                                                     # (K, E)
    cls_row = cls_token.reshape(1, e) + positions[0:1, :]             # (1, E)
    patch_rows = bias[None, :] + positions[1:, :]                     # (N, E)
    add_table = jnp.concatenate([cls_row, patch_rows], axis=0)        # (N+1, E)
    add_tile = jnp.tile(add_table, (tb, 1)).astype(jnp.float32)   # (TB*(N+1), E)

    grid_spec = pltpu.PrefetchScalarGridSpec(
        num_scalar_prefetch=0,
        grid=(nb,),
        in_specs=[
            pl.BlockSpec((tile_rows, k), lambda i: (i, 0)),   # per-step rows
            pl.BlockSpec((k, e), lambda i: (0, 0)),           # weight (const)
            pl.BlockSpec((tile_rows, e), lambda i: (0, 0)),   # add table (const)
        ],
        out_specs=pl.BlockSpec((tile_rows, e), lambda i: (i, 0)),
    )

    cost = pl.CostEstimate(
        flops=2 * b_pad * rows_per_b * k * e,
        transcendentals=0,
        bytes_accessed=(
            x2d.size * jnp.dtype(x2d.dtype).itemsize
            + wt.size * jnp.dtype(wt.dtype).itemsize
            + add_tile.size * 4
            + b_pad * rows_per_b * e * out_itemsize),
    )

    out = pl.pallas_call(
        _patch_embed_kernel,
        out_shape=jax.ShapeDtypeStruct((b_pad * rows_per_b, e), x.dtype),
        grid_spec=grid_spec,
        compiler_params=pltpu.CompilerParams(
            dimension_semantics=("parallel",)),
        cost_estimate=cost,
    )(x2d, wt, add_tile)

    out = out.reshape(b_pad, rows_per_b, e)       # free row-major reshape
    return out[:b] if b_pad != b else out


if __name__ == "__main__":
    # Shapes consistent with the module's forward:
    #   in_channels=4, patch_size=4, emb_size=32, seq_length=16 -> num_patches=4
    B, C, PATCH, EMB, SEQ = 8, 4, 4, 32, 16
    H, W = 1, SEQ
    N = (H * W) // PATCH

    key = jax.random.PRNGKey(0)
    kx, kw, kb, kc, kp = jax.random.split(key, 5)
    x = jax.random.normal(kx, (B, C, H, W), dtype=jnp.float32)
    weight = jax.random.normal(kw, (EMB, PATCH * C), dtype=jnp.float32) * 0.02
    bias = jax.random.normal(kb, (EMB,), dtype=jnp.float32) * 0.02
    cls_token = jax.random.normal(kc, (1, 1, EMB), dtype=jnp.float32)
    positions = jax.random.normal(kp, (N + 1, EMB), dtype=jnp.float32)

    out = patch_embedding_linear(x, weight, bias, cls_token, positions, PATCH)
    out = jax.block_until_ready(out)

    # Pure-JAX reference for correctness.
    xr_ref = x.reshape(B, C, H, W // PATCH, PATCH)
    xr_ref = jnp.transpose(xr_ref, (0, 2, 3, 4, 1)).reshape(B, N, PATCH * C)
    proj = xr_ref @ weight.T + bias
    cls = jnp.broadcast_to(cls_token, (B, 1, EMB))
    ref = jnp.concatenate([cls, proj], axis=1) + positions

    assert out.shape == (B, N + 1, EMB)
    assert bool(jnp.allclose(out, ref, atol=1e-4, rtol=1e-4))
    print("KERNEL_OK")
</pallas_src>

<mosaic_0001>
module attributes {stable_mosaic.version = 11 : i64} {
  func.func @_patch_embed_kernel(%arg0: i32, %arg1: memref<40x16xf32, #tpu.memory_space<vmem>>, %arg2: memref<16x32xf32, #tpu.memory_space<vmem>>, %arg3: memref<40x32xf32, #tpu.memory_space<vmem>>, %arg4: memref<40x32xf32, #tpu.memory_space<vmem>>) attributes {dimension_semantics = [#tpu.dimension_semantics<parallel>], iteration_bounds = array<i64: 1>, scalar_prefetch = 0 : i64, scratch_operands = 0 : i64, tpu.core_type = #tpu.core_type<tc>, window_params = [{transform_indices = @transform_0, window_bounds = array<i64: 40, 16>}, {pipeline_mode = #tpu.pipeline_mode<synchronous>, transform_indices = @transform_1, window_bounds = array<i64: 16, 32>}, {pipeline_mode = #tpu.pipeline_mode<synchronous>, transform_indices = @transform_2, window_bounds = array<i64: 40, 32>}, {transform_indices = @transform_3, window_bounds = array<i64: 40, 32>}]} {
    %c0 = arith.constant 0 : index
    %c0_0 = arith.constant 0 : index
    %0 = vector.load %arg1[%c0, %c0_0] : memref<40x16xf32, #tpu.memory_space<vmem>>, vector<40x16xf32>
    %c0_1 = arith.constant 0 : index
    %c0_2 = arith.constant 0 : index
    %1 = vector.load %arg2[%c0_1, %c0_2] : memref<16x32xf32, #tpu.memory_space<vmem>>, vector<16x32xf32>
    %cst = arith.constant dense<0.000000e+00> : vector<40x32xf32>
    %2 = tpu.matmul %0, %1, %cst {dimension_numbers = #tpu.dot_dimension_numbers<[1], [0], [0], [1], [0, 0, 1, 1], [], []>} : vector<40x16xf32>, vector<16x32xf32>, vector<40x32xf32> -> vector<40x32xf32>
    %c0_3 = arith.constant 0 : index
    %c0_4 = arith.constant 0 : index
    %3 = vector.load %arg3[%c0_3, %c0_4] : memref<40x32xf32, #tpu.memory_space<vmem>>, vector<40x32xf32>
    %4 = arith.addf %2, %3 : vector<40x32xf32>
    %c0_5 = arith.constant 0 : index
    %c0_6 = arith.constant 0 : index
    %5 = vector.load %arg4[%c0_5, %c0_6] : memref<40x32xf32, #tpu.memory_space<vmem>>, vector<40x32xf32>
    tpu.vector_store %arg4[%c0_5, %c0_6], %4 {strides = array<i32>} : memref<40x32xf32, #tpu.memory_space<vmem>>, vector<40x32xf32>,
    return
  }
  func.func @transform_0(%arg0: i32) -> (i32, i32) {
    %c0_i32 = arith.constant 0 : i32
    %c0_i32_0 = arith.constant 0 : i32
    return %arg0, %c0_i32 : i32, i32
  }
  func.func @transform_1(%arg0: i32) -> (i32, i32) {
    %c0_i32 = arith.constant 0 : i32
    %c0_i32_0 = arith.constant 0 : i32
    %c0_i32_1 = arith.constant 0 : i32
    return %c0_i32, %c0_i32_0 : i32, i32
  }
  func.func @transform_2(%arg0: i32) -> (i32, i32) {
    %c0_i32 = arith.constant 0 : i32
    %c0_i32_0 = arith.constant 0 : i32
    %c0_i32_1 = arith.constant 0 : i32
    return %c0_i32, %c0_i32_0 : i32, i32
  }
  func.func @transform_3(%arg0: i32) -> (i32, i32) {
    %c0_i32 = arith.constant 0 : i32
    %c0_i32_0 = arith.constant 0 : i32
    return %arg0, %c0_i32 : i32, i32
  }
}

</mosaic_0001>

<bundles_post_ra>
// kernel: tpu_custom_call.1
= control target key start
LH: loop header
LB: loop body
LE: loop exit
PB: predicated region body
PF: predicated region fallthrough
CT: control target
= control target key end

     0   :  { %v181_v0 = vmov 0.0|0.0   ;;  %vm182_vm0 = vmmov 0   ;;  %v183_v4 = vmov 0.0   ;;  %vm26_vm1 = vcmask 130048   ;;  %s265_s1 = inlined_call_operand.vmem [shape: f32[16,32], index: 1, kind: input, shape index: {}]   ;;  %s266_s0 = inlined_call_operand.vmem [shape: f32[40,16], index: 0, kind: input, shape index: {}]   ;;  %s267_s2 = inlined_call_operand.vmem [shape: f32[40,32], index: 2, kind: input, shape index: {}]   ;;  %s268_s3 = inlined_call_operand.vmem [shape: f32[40,32], index: 3, kind: output, shape index: {}]  }
   0x1   :  { %173 = vmatprep.subr.bf16.mxu0 %v181_v0  ;;  %v19_v1 = vld [vmem:[%s265_s1] sm:$0xff]  ;;  %v20_v2 = vld [vmem:[%s265_s1 + $0x8] sm:$0xff]  ;;  %176 = vmatprep.subr.bf16.mxu1 %v181_v0  ;;  %v17_v6 = vld [vmem:[%s266_s0 + $0x18] sm:$0xff]  ;;  %vm132_vm2 = vcmask 261120  }
   0x2   :  { %v174_v3 = vpack.c.bf16 %v20_v2, %v19_v1  ;;  %158 = vmatprep.mubr.msk.f32.mxu0 %vm182_vm0, %v183_v4  ;;  %167 = vmatprep.mubr.msk.f32.mxu1 %vm182_vm0, %v183_v4  ;;  %v14_v5 = vld [vmem:[%s266_s0] sm:$0xff]  ;;  %v15_v7 = vld [vmem:[%s266_s0 + $0x8] sm:$0xff]  ;;  %v16_v9 = vld [vmem:[%s266_s0 + $0x10] sm:$0xff] }
   0x3   :  { %v18_v8 = vld [vmem:[%s266_s0 + $0x20] sm:$0xff]  ;;  %v24_v11 = vld [vmem:[%s267_s2 + $0x18] sm:$0xff]  ;;  %v22_v18 = vld [vmem:[%s267_s2 + $0x8] sm:$0xff] }
   0x4   :  { %175 = vmatpush3.bf16.msra.mxu0 %v174_v3  ;;  %177 = vmatpush3.bf16.msra.mxu1 %v174_v3  ;;  %v21_v10 = vld [vmem:[%s267_s2] sm:$0xff]  ;;  %v23_v26 = vld [vmem:[%s267_s2 + $0x10] sm:$0xff] }
   0x5   :  { %v25_v19 = vld [vmem:[%s267_s2 + $0x20] sm:$0xff] }
   0x7   :  { %159 = vmatmul.mubr.msk.f32.vlgmr.msra.gmra.mrb[0].mxu0 %vm26_vm1, %v14_v5  ;;  %168 = vmatmul.mubr.msk.f32.vlgmr.msra.gmra.mrb[0].mxu1 %vm26_vm1, %v17_v6 }
   0x8   :  { %161 = vmatprep.mubr.msk.f32.mxu0 %vm182_vm0, %v183_v4  ;;  %170 = vmatprep.mubr.msk.f32.mxu1 %vm182_vm0, %v183_v4 }
   0xb   :  { %162 = vmatmul.mubr.msk.f32.gmra.mrb[2].mxu0 %vm26_vm1, %v15_v7  ;;  %171 = vmatmul.mubr.msk.f32.gmra.mrb[2].mxu1 %vm26_vm1, %v18_v8 }
   0xc   :  { %164 = vmatprep.mubr.msk.f32.mxu0 %vm182_vm0, %v183_v4 }
   0xf   :  { %165 = vmatmul.mubr.msk.f32.gmra.mrb[4].mxu0 %vm26_vm1, %v16_v9 }
  0xda   :  { %v108_v12 = vpop.f32.mrb[0].mxu0  ;;  %v123_v13 = vpop.f32.mrb[0].mxu1 }
  0xdb   :  { %v109_v14 = vadd.f32 %v108_v12, %v21_v10  ;;  %v160_v15 = vpop.f32.mrb[1].mxu0  ;;  %v124_v16 = vadd.f32 %v123_v13, %v24_v11  ;;  %v169_v17 = vpop.f32.mrb[1].mxu1 }
  0xdd   :  { %133 = vst.msk [vmem:[%s268_s3] sm:$0xff] %vm132_vm2, %v109_v14  ;;  %136 = vst.msk [vmem:[%s268_s3 + $0x18] sm:$0xff] %vm132_vm2, %v124_v16 }
  0xde   :  { %v113_v20 = vpop.f32.mrb[2].mxu0  ;;  %v128_v21 = vpop.f32.mrb[2].mxu1 }
  0xdf   :  { %v114_v22 = vadd.f32 %v113_v20, %v22_v18  ;;  %v163_v23 = vpop.f32.mrb[3].mxu0  ;;  %v129_v24 = vadd.f32 %v128_v21, %v25_v19  ;;  %v172_v25 = vpop.f32.mrb[3].mxu1 }
  0xe1   :  { %134 = vst.msk [vmem:[%s268_s3 + $0x8] sm:$0xff] %vm132_vm2, %v114_v22  ;;  %137 = vst.msk [vmem:[%s268_s3 + $0x20] sm:$0xff] %vm132_vm2, %v129_v24 }
  0xe2   :  { %v118_v27 = vpop.f32.mrb[4].mxu0 }
  0xe3   :  { %v119_v28 = vadd.f32 %v118_v27, %v23_v26  ;;  %v166_v29 = vpop.f32.mrb[5].mxu0 }
  0xe5   :  { %135 = vst.msk [vmem:[%s268_s3 + $0x10] sm:$0xff] %vm132_vm2, %v119_v28 }

</bundles_post_ra>
